<compile_context>
chip_gen: v7x
topology: tpu7x:2x2x1
jax: 0.10.0
libtpu: 0.0.40
codegen_flags: <defaults>
</compile_context>

<pallas_src>
import math

import jax
import jax.numpy as jnp
from jax.experimental import pallas as pl
from jax.experimental.pallas import tpu as pltpu


_BIG_ENOUGH_TO_SPLIT = 1 << 20  # elements; below this a single DMA is optimal


def _make_dma_copy_kernel(nchunks: int):
    """Build a kernel that issues `nchunks` HBM->HBM DMAs then waits on all."""

    def kernel(x_ref, o_ref, sems):
        copies = []
        for c in range(nchunks):  # static unroll; nchunks is 1..4
            cp = pltpu.make_async_copy(x_ref.at[c], o_ref.at[c], sems.at[c])
            cp.start()
            copies.append(cp)
        for cp in copies:
            cp.wait()

    return kernel


def _choose_chunks(total: int) -> int:
    """Pick how many DMAs to keep in flight.

    Only split when the tensor is large enough for overlap to matter and the
    flat length divides evenly (avoids ragged chunk shapes)."""
    if total >= _BIG_ENOUGH_TO_SPLIT:
        for n in (4, 2):
            if total % n == 0:
                return n
    return 1


@jax.jit
def passthrough(x: jax.Array) -> jax.Array:
    """Identity forward pass of PassThrough via a direct HBM->HBM DMA copy."""
    # TODO(synk): with guaranteed donation (jax.jit(..., donate_argnums=0) at
    # the enclosing jit) one could alias the output to the input and move zero
    # bytes; kept as a genuine DMA copy so semantics hold whether or not x is
    # donated.
    orig_shape = x.shape
    total = math.prod(orig_shape) if orig_shape else 1
    nchunks = _choose_chunks(total)
    chunk = total // nchunks
    x_flat = x.reshape(nchunks, chunk)

    y_flat = pl.pallas_call(
        _make_dma_copy_kernel(nchunks),
        out_shape=jax.ShapeDtypeStruct((nchunks, chunk), x.dtype),
        in_specs=[pl.BlockSpec(memory_space=pl.ANY)],
        out_specs=pl.BlockSpec(memory_space=pl.ANY),
        scratch_shapes=[pltpu.SemaphoreType.DMA((nchunks,))],
    )(x_flat)
    return y_flat.reshape(orig_shape)


if __name__ == "__main__":
    key = jax.random.PRNGKey(0)
    # Small shape consistent with a generic (batch, seq, hidden) tensor.
    x = jax.random.normal(key, (2, 8, 32), dtype=jnp.float32)
    y = jax.block_until_ready(passthrough(x))
    assert y.shape == x.shape and y.dtype == x.dtype
    assert bool(jnp.array_equal(y, x))

    # Also exercise the multi-chunk DMA path (larger, sub-32-bit dtype).
    x2 = jax.random.normal(jax.random.PRNGKey(1), (8, 256, 512), dtype=jnp.bfloat16)
    y2 = jax.block_until_ready(passthrough(x2))
    assert y2.shape == x2.shape and y2.dtype == x2.dtype
    assert bool(jnp.array_equal(y2, x2))

    print("KERNEL_OK")
</pallas_src>

<mosaic_0001>
module attributes {stable_mosaic.version = 11 : i64} {
  func.func @kernel(%arg0: memref<1x512xf32, #tpu.memory_space<any>>, %arg1: memref<1x512xf32, #tpu.memory_space<any>>, %arg2: memref<1x!tpu.dma_semaphore, #tpu.memory_space<semaphore_mem>>) attributes {dimension_semantics = [], scalar_prefetch = 0 : i64, scratch_operands = 1 : i64, tpu.core_type = #tpu.core_type<tc>} {
    %c0_i32 = arith.constant 0 : i32
    %c0_i32_0 = arith.constant 0 : i32
    %c0_i32_1 = arith.constant 0 : i32
    %c0_i32_2 = arith.constant 0 : i32
    %0 = tpu.memref_slice %arg0[%c0_i32, %c0_i32_2] : memref<1x512xf32, #tpu.memory_space<any>> -> memref<1x512xf32, #tpu.memory_space<any>>
    %1 = tpu.memref_squeeze %0 : memref<1x512xf32, #tpu.memory_space<any>> -> memref<512xf32, #tpu.memory_space<any>>
    %c0_i32_3 = arith.constant 0 : i32
    %2 = tpu.memref_slice %arg1[%c0_i32_0, %c0_i32_3] : memref<1x512xf32, #tpu.memory_space<any>> -> memref<1x512xf32, #tpu.memory_space<any>>
    %3 = tpu.memref_squeeze %2 : memref<1x512xf32, #tpu.memory_space<any>> -> memref<512xf32, #tpu.memory_space<any>>
    %4 = tpu.memref_slice %arg2[%c0_i32_1] : memref<1x!tpu.dma_semaphore, #tpu.memory_space<semaphore_mem>> -> memref<1x!tpu.dma_semaphore, #tpu.memory_space<semaphore_mem>>
    %5 = tpu.memref_squeeze %4 : memref<1x!tpu.dma_semaphore, #tpu.memory_space<semaphore_mem>> -> memref<!tpu.dma_semaphore, #tpu.memory_space<semaphore_mem>>
    tpu.enqueue_dma source(%1 : memref<512xf32, #tpu.memory_space<any>>) target(%3 : memref<512xf32, #tpu.memory_space<any>>) target_semaphore(%5 : memref<!tpu.dma_semaphore, #tpu.memory_space<semaphore_mem>>)
    %c0_i32_4 = arith.constant 0 : i32
    %c0_i32_5 = arith.constant 0 : i32
    %c0_i32_6 = arith.constant 0 : i32
    %c0_i32_7 = arith.constant 0 : i32
    %6 = tpu.memref_slice %arg0[%c0_i32_4, %c0_i32_7] : memref<1x512xf32, #tpu.memory_space<any>> -> memref<1x512xf32, #tpu.memory_space<any>>
    %7 = tpu.memref_squeeze %6 : memref<1x512xf32, #tpu.memory_space<any>> -> memref<512xf32, #tpu.memory_space<any>>
    %c0_i32_8 = arith.constant 0 : i32
    %8 = tpu.memref_slice %arg1[%c0_i32_5, %c0_i32_8] : memref<1x512xf32, #tpu.memory_space<any>> -> memref<1x512xf32, #tpu.memory_space<any>>
    %9 = tpu.memref_squeeze %8 : memref<1x512xf32, #tpu.memory_space<any>> -> memref<512xf32, #tpu.memory_space<any>>
    %10 = tpu.memref_slice %arg2[%c0_i32_6] : memref<1x!tpu.dma_semaphore, #tpu.memory_space<semaphore_mem>> -> memref<1x!tpu.dma_semaphore, #tpu.memory_space<semaphore_mem>>
    %11 = tpu.memref_squeeze %10 : memref<1x!tpu.dma_semaphore, #tpu.memory_space<semaphore_mem>> -> memref<!tpu.dma_semaphore, #tpu.memory_space<semaphore_mem>>
    tpu.wait_dma2 semaphore(%11 : memref<!tpu.dma_semaphore, #tpu.memory_space<semaphore_mem>>) src(%7 : memref<512xf32, #tpu.memory_space<any>>) dst(%9 : memref<512xf32, #tpu.memory_space<any>>)
    return
  }
}

</mosaic_0001>

<bundles_post_ra>
// kernel: passthrough.1
= control target key start
LH: loop header
LB: loop body
LE: loop exit
PB: predicated region body
PF: predicated region fallthrough
CT: control target
= control target key end

     0   :  { %s87_s0 = inlined_call_operand.vmem [shape: f32[1,512], index: 0, kind: input, shape index: {}]   ;;  %s88_s1 = inlined_call_operand.vmem [shape: f32[1,512], index: 1, kind: output, shape index: {}]  }
   0x1   :  { %v23_v0 = vld [vmem:[%s87_s0] sm:$0xf] }
   0x2   :  { %24 = vst [vmem:[%s88_s1] sm:$0xf] %v23_v0 }
   0x3   :  { %49 = vsyncadd [#allocation2], 64 }
   0x4   :  { %69 = dma.done.wait [#allocation2], 64 }
   0x5   :  { %70 = vsyncadd [#allocation2], 4294967232 }
   0x6   :  { %52 = vsyncmov [#allocation2] }
   0x9   :  { %s53_s10 = vpop.sfrf %52 }
   0xa   :  { %p68_p0 = scmp.ne.s32.totalorder %s53_s10, 0 }
   0xc   :  { %57 = shalt.err (%p68_p0)  }

</bundles_post_ra>
